<compile_context>
chip_gen: v6e
topology: v6e:2x2x1
jax: 0.10.0
libtpu: 0.0.40
codegen_flags: <defaults>
</compile_context>

<pallas_src>
import functools

import jax
import jax.numpy as jnp
from jax.experimental import pallas as pl
from jax.experimental.pallas import tpu as pltpu

MAX_ITEMS = 447113.0
MIN_ITEMS = 1001.0

LANES = 128
SUBLANES = 8
_MIB = 1024 * 1024

# dtype -> (lo, hi) for a *native-dtype* compare exactly equivalent to
# (x_f32 >= 1001) & (x_f32 <= 447113):
#   bf16: spacing is 2 near 1001 and 1024 near 447113 -> round MIN up to the
#         next representable value (1002) and MAX down (446464).
#   fp16: 1001 is representable; every finite fp16 < 447113, so the upper
#         bound collapses to the max finite value (inf/NaN still map to 0).
#   f32 : both thresholds are exact.
_NATIVE_BOUNDS = {
    jnp.dtype(jnp.float32): (1001.0, 447113.0),
    jnp.dtype(jnp.bfloat16): (1002.0, 446464.0),
    jnp.dtype(jnp.float16): (1001.0, 65504.0),
}


def _compare_config(dtype):
    d = jnp.dtype(dtype)
    if d in _NATIVE_BOUNDS:
        lo, hi = _NATIVE_BOUNDS[d]
        return lo, hi, d
    # ints / exotic floats: compare in f32 (thresholds exact, values near the
    # thresholds are < 2^24 so the upcast is exact there).
    return MIN_ITEMS, MAX_ITEMS, jnp.dtype(jnp.float32)


def _exilu_kernel(x_ref, o_ref, *, lo, hi, cmp_dtype):
    x = x_ref[...]
    xc = x if x.dtype == cmp_dtype else x.astype(cmp_dtype)
    keep = jnp.logical_and(xc >= lo, xc <= hi)
    o_ref[...] = jnp.where(keep, x, jnp.zeros_like(x))


def _default_block_bytes() -> int:
    """~8 MiB tiles on v7x (fast HBM, 64 MiB VMEM/TC), ~4 MiB on v5e/v6e."""
    try:
        info = pltpu.get_tpu_info()
        vmem = getattr(info, "vmem_capacity_bytes", 128 * _MIB)
        if vmem <= 64 * _MIB:  # v7x TensorCore
            return 8 * _MIB
    except Exception:
        pass
    return 4 * _MIB


def _round_up(v: int, m: int) -> int:
    return -(-v // m) * m


def exilu(x: jax.Array, *, block_bytes: int | None = None) -> jax.Array:
    """Existent Linear Unit: x where MIN_ITEMS <= x <= MAX_ITEMS, else 0."""
    orig_shape = x.shape
    dtype = x.dtype
    n = int(x.size)
    if n == 0:
        return x
    if block_bytes is None:
        block_bytes = _default_block_bytes()

    itemsize = jnp.dtype(dtype).itemsize
    sub = SUBLANES * max(1, 4 // itemsize)  # sublane multiple for packed dtypes
    chunk = sub * LANES                     # elements in one fully packed tile

    lo, hi, cmp_dtype = _compare_config(dtype)
    kernel = functools.partial(_exilu_kernel, lo=lo, hi=hi, cmp_dtype=cmp_dtype)
    cost = pl.CostEstimate(flops=4 * n, transcendentals=0,
                           bytes_accessed=2 * n * itemsize)
    vmem_limit = min(96 * _MIB, 4 * block_bytes + 16 * _MIB)

    flat = x.reshape(-1)  # free bitcast, no data movement

    if n % LANES == 0 and n >= chunk:
        # Lane-dense 2-D view; single pallas_call over everything.
        rows = n // LANES
        x2d = flat.reshape(rows, LANES)

        # Target ~block_bytes per tile, but shape the "parallel" grid into at
        # least ~4 near-equal steps when the array allows it so v7x's two
        # TensorCores split the work evenly (no effect on v5e/v6e).
        tr_target = max(sub, (block_bytes // (LANES * itemsize)) // sub * sub)
        max_steps = max(1, rows // sub)
        steps = max(pl.cdiv(rows, tr_target), min(4, max_steps))
        tr = _round_up(pl.cdiv(rows, steps), sub)
        tr = max(sub, min(tr, (rows // sub) * sub))
        grid = (pl.cdiv(rows, tr),)  # cdiv grid: partial last block is masked

        out2d = pl.pallas_call(
            kernel,
            out_shape=jax.ShapeDtypeStruct((rows, LANES), dtype),
            grid_spec=pltpu.PrefetchScalarGridSpec(
                num_scalar_prefetch=0,
                grid=grid,
                in_specs=[pl.BlockSpec((tr, LANES), lambda i: (i, 0))],
                out_specs=pl.BlockSpec((tr, LANES), lambda i: (i, 0)),
            ),
            compiler_params=pltpu.CompilerParams(
                dimension_semantics=("parallel",),
                vmem_limit_bytes=vmem_limit,
            ),
            cost_estimate=cost,
        )(x2d)
        return out2d.reshape(orig_shape)

    single_block_elems = max(chunk, block_bytes // itemsize)
    if n <= single_block_elems:
        # Ragged or tiny sizes that fit VMEM: one whole-array 1-D block
        # (always legal: full-extent blocks need no (8,128) divisibility).
        out_flat = pl.pallas_call(
            kernel,
            out_shape=jax.ShapeDtypeStruct((n,), dtype),
            cost_estimate=cost,
        )(flat)
        return out_flat.reshape(orig_shape)

    # Large ragged n: blocked 1-D cdiv grid; Pallas masks the partial last
    # block, so no prefix slice / tail concatenate / padding pass is needed.
    blk = max(chunk, (block_bytes // itemsize) // chunk * chunk)
    out_flat = pl.pallas_call(
        kernel,
        out_shape=jax.ShapeDtypeStruct((n,), dtype),
        grid_spec=pltpu.PrefetchScalarGridSpec(
            num_scalar_prefetch=0,
            grid=(pl.cdiv(n, blk),),
            in_specs=[pl.BlockSpec((blk,), lambda i: (i,))],
            out_specs=pl.BlockSpec((blk,), lambda i: (i,)),
        ),
        compiler_params=pltpu.CompilerParams(
            dimension_semantics=("parallel",),
            vmem_limit_bytes=vmem_limit,
        ),
        cost_estimate=cost,
    )(flat)
    return out_flat.reshape(orig_shape)


if __name__ == "__main__":
    k1, k2, k3 = jax.random.split(jax.random.PRNGKey(0), 3)

    def ref_fn(v):
        vf = v.astype(jnp.float32)
        return jnp.where((vf >= MIN_ITEMS) & (vf <= MAX_ITEMS), v,
                         jnp.zeros_like(v))

    # Lane-aligned path (n % 128 == 0): 2-D lane-dense blocked grid.
    x = jax.random.uniform(k1, (2, 4, 16, 16), dtype=jnp.float32,
                           minval=0.0, maxval=2.0 * MAX_ITEMS)
    y = jax.block_until_ready(exilu(x))
    assert y.shape == x.shape and y.dtype == x.dtype
    assert jnp.array_equal(y, ref_fn(x)), "mismatch vs reference (aligned path)"

    # Ragged size (n % 128 != 0): single whole-array block, no slice/concat.
    x2 = jax.random.uniform(k2, (3, 5, 77), dtype=jnp.float32,
                            minval=0.0, maxval=2.0 * MAX_ITEMS)
    y2 = jax.block_until_ready(exilu(x2))
    assert y2.shape == x2.shape and y2.dtype == x2.dtype
    assert jnp.array_equal(y2, ref_fn(x2)), "mismatch vs reference (ragged path)"

    # bf16 exercises the native-dtype compare (no f32 upcast in the kernel).
    x3 = jax.random.uniform(k3, (4, 8, 64), dtype=jnp.float32,
                            minval=0.0, maxval=2.0 * MAX_ITEMS).astype(jnp.bfloat16)
    y3 = jax.block_until_ready(exilu(x3))
    assert y3.shape == x3.shape and y3.dtype == x3.dtype
    assert jnp.array_equal(y3, ref_fn(x3)), "mismatch vs reference (bf16 path)"

    print("KERNEL_OK")
</pallas_src>

<mosaic_0001>
module attributes {stable_mosaic.version = 11 : i64} {
  func.func @_exilu_kernel(%arg0: i32, %arg1: memref<8x128xf32, #tpu.memory_space<vmem>>, %arg2: memref<8x128xf32, #tpu.memory_space<vmem>>) attributes {dimension_semantics = [#tpu.dimension_semantics<parallel>], iteration_bounds = array<i64: 2>, scalar_prefetch = 0 : i64, scratch_operands = 0 : i64, tpu.core_type = #tpu.core_type<tc>, window_params = [{transform_indices = @transform_0, window_bounds = array<i64: 8, 128>}, {transform_indices = @transform_1, window_bounds = array<i64: 8, 128>}]} {
    %c0 = arith.constant 0 : index
    %c0_0 = arith.constant 0 : index
    %0 = vector.load %arg1[%c0, %c0_0] : memref<8x128xf32, #tpu.memory_space<vmem>>, vector<8x128xf32>
    %cst = arith.constant 1.001000e+03 : f32
    %1 = vector.broadcast %cst : f32 to vector<8x128xf32>
    %2 = arith.cmpf oge, %0, %1 : vector<8x128xf32>
    %cst_1 = arith.constant 4.471130e+05 : f32
    %3 = vector.broadcast %cst_1 : f32 to vector<8x128xf32>
    %4 = arith.cmpf ole, %0, %3 : vector<8x128xf32>
    %5 = arith.andi %2, %4 : vector<8x128xi1>
    %cst_2 = arith.constant 0.000000e+00 : f32
    %6 = vector.broadcast %cst_2 : f32 to vector<8x128xf32>
    %7 = arith.select %5, %0, %6 : vector<8x128xi1>, vector<8x128xf32>
    %c0_3 = arith.constant 0 : index
    %c0_4 = arith.constant 0 : index
    %8 = vector.load %arg2[%c0_3, %c0_4] : memref<8x128xf32, #tpu.memory_space<vmem>>, vector<8x128xf32>
    tpu.vector_store %arg2[%c0_3, %c0_4], %7 {strides = array<i32>} : memref<8x128xf32, #tpu.memory_space<vmem>>, vector<8x128xf32>,
    return
  }
  func.func @transform_0(%arg0: i32) -> (i32, i32) {
    %c0_i32 = arith.constant 0 : i32
    %c0_i32_0 = arith.constant 0 : i32
    return %arg0, %c0_i32 : i32, i32
  }
  func.func @transform_1(%arg0: i32) -> (i32, i32) {
    %c0_i32 = arith.constant 0 : i32
    %c0_i32_0 = arith.constant 0 : i32
    return %arg0, %c0_i32 : i32, i32
  }
}

</mosaic_0001>

<bundles_post_ra>
// kernel: tpu_custom_call.1
= control target key start
LH: loop header
LB: loop body
LE: loop exit
PB: predicated region body
PF: predicated region fallthrough
CT: control target
= control target key end

     0   :  { %6 = vsyncpa [#allocation3], 0  ;;  %s533_s0 = inlined_call_operand.hbm [shape: f32[16,128], index: 0, kind: input, shape index: {}]   ;;  %s534_s1 = inlined_call_operand.hbm [shape: f32[16,128], index: 1, kind: output, shape index: {}]  }
   0x1   :  { %8 = vsyncpa [#allocation3 + $0x1], 0 }
   0x2   :  { %9 = vsyncpa [#allocation4], 0 }
   0x3   :  { %11 = vsyncpa [#allocation4 + $0x1], 0  ;;  %s386_s6 = smov 0   ;;  %s388_s7 = smov 0  }
   0x4   :  { %s390_s8 = smov 0   ;;  %s392_s9 = smov 0  }
   0x5 LB: > { %s407_s10 = sadd.s32 4294967295, %s372_s9   ;;  %s222_s11 = sadd.s32 4294967294, %s372_s9   ;;  %s372_s9 = sphi %s392_s9, %s551_s9   ;;  %s368_s8 = sphi %s390_s8, %s550_s8   ;;  %s364_s7 = sphi %s388_s7, %s549_s7   ;;  %s360_s6 = sphi %s386_s6, %s548_s6  }
   0x6   : > { %s411_s12 = sadd.s32 1, %s372_s9   ;;  %s24_s13 = sadd.s32 1, %s368_s8 }
   0x7   : > { %s21_s14 = ssub.s32 %s372_s9, %s411_s12  ;;  %p31_p0 = scmp.ne.s32.totalorder %s368_s8, %s364_s7 }
   0x8   : > { %p22_p1 = scmp.eq.s32.totalorder %s21_s14, 0  ;;  %p32_p2 = scmp.eq.s32.totalorder %s372_s9, 0 }
   0x9   : > { %p37_p3 = scmp.ne.s32.totalorder %s364_s7, %s360_s6  ;;  %p38_p4 = scmp.eq.s32.totalorder %s407_s10, 0 }
   0xa   : > { %s423_s15 = scalar_select %p22_p1, %s368_s8, %s24_s13  }
   0xb   : > { %p425_p5 = por %p32_p2, %p31_p0  ;;  %p429_p6 = por %p38_p4, %p37_p3 }
   0xc   : > { %p61_p7 = scmp.eq.s32.totalorder %s407_s10, 1  ;;  %p67_p8 = scmp.eq.s32.totalorder %s222_s11, 1 }
   0xd   : > { %s538_s17 = scalar_select %p429_p6, 1, 0 }
   0xe   : > { %p246_p10 = scmp.lt.s32.totalorder %s372_s9, 2  ;;  %p436_p11 = por %p61_p7, %p31_p0 }
   0xf   : > { %p440_p12 = por %p67_p8, %p37_p3  ;;  %s87_s20 = sand.u32 1, %s368_s8  }
  0x10   : > { %s539_s18 = scalar_select %p436_p11, 1, 0 }
  0x11   : > { %s540_s19 = scalar_select %p440_p12, 1, 0 }
  0x12   : > { %s226_s21 = sshll.u32 %s372_s9, 7  ;;  %s225_s22 = sshll.u32 %s87_s20, 3 }
  0x13   : > { %s449_s25 = scalar_lea.hbm %s533_s0, %s226_s21  ;;  %s91_s26 = scalar_lea.vmem [#allocation2], %s225_s22 }
  0x14   : > { %s98_s27 = sshll.u32 %s91_s26, 4  ;;  %p453_p13 = pnand %p246_p10, %p425_p5  ;;  %s457_s27 = int_to_ptr.vmem [resolvable:$true] %s98_s27 }
  0x15   : > { %s88_s29 = scalar_lea.sflag [#allocation3], %s87_s20  ;;  %s280_s30 = scalar_lea.hbm %s449_s25, 128 }
  0x16   : > { %p281_p2 = scmp.ne.s32.totalorder %s449_s25, %s280_s30  ;;  %p282_p3 = pneg %p453_p13 }
  0x17   : > { %s285_s4 = scalar_lea.hbm %s533_s0, 256  ;;  %p286_p5 = scmp.lt.s32.totalorder %s449_s25, %s533_s0 }
  0x18   : > { %p283_p4 = pnand %p282_p3, %p281_p2  ;;  %p287_p8 = scmp.lt.s32.totalorder %s285_s4, %s280_s30 }
  0x1a   : > { %p284_p7 = pneg %p283_p4  ;;  %p288_p10 = por %p287_p8, %p286_p5 }
  0x1c   : > { %p289_p9 = pnand %p288_p10, %p284_p7 }
  0x1e   : > { %292 = shalt.err (!%p289_p9)
}
  0x1f   : > { %s293_s13 = scalar_lea.vmem %s457_s27, 128  ;;  %s374_s14 = smov [#allocation2]  }
  0x20   : > { %p294_p0 = scmp.ne.s32.totalorder %s457_s27, %s293_s13  ;;  %s298_s16 = sshll.u32 %s374_s14, 4  ;;  %s299_s16 = int_to_ptr.vmem [resolvable:$false] %s298_s16 }
  0x21   : > { %s300_s20 = scalar_lea.vmem %s299_s16, 256  ;;  %p301_p4 = scmp.lt.s32.totalorder %s457_s27, %s299_s16 }
  0x22   : > { %p296_p1 = pnand %p294_p0, %p282_p3  ;;  %p302_p12 = scmp.lt.s32.totalorder %s300_s20, %s293_s13 }
  0x24   : > { %p297_p2 = pneg %p296_p1  ;;  %p303_p11 = por %p302_p12, %p301_p4 }
  0x26   : > { %p304_p6 = pnand %p303_p11, %p297_p2 }
  0x28   : > { %307 = shalt.err (!%p304_p6)
}
  0x29   : > { %241 = dma.hbm_to_vmem [thread:$0]  (!%p453_p13), %s449_s25, 128, %s457_s27, %s88_s29  }
  0x2a   : > { %p542_p9 = scmp.lt.s32.totalorder %s372_s9, 3  ;;  %p543_p7 = scmp.ge.s32.totalorder %s372_s9, 1 }
  0x2c   : > { %p104_p0 = pnand %p543_p7, %p542_p9 }
  0x2d   : > { %s484_s21 = sand.u32 (!%p104_p0), 1, %s364_s7   ;;  %p544_p6 = scmp.ne.s32.totalorder (!%p104_p0), %s538_s17, 0 }
  0x2e   : > { %107 = sbr.rel (%p104_p0) target bundleno = 77 (0x4d), region = 24  ;;  %s228_s22 = sshll.u32 (!%p104_p0), %s484_s21, 3 }
  0x2f   : > { %s110_s23 = scalar_lea.sflag (!%p104_p0), [#allocation3], %s484_s21  ;;  %s113_s24 = scalar_lea.vmem (!%p104_p0), [#allocation2], %s228_s22 }
  0x33   : > { %351 = dma.done.wait (%p544_p6), %s110_s23, 128  }
  0x34   : > { %353 = vsyncadd (%p544_p6), %s110_s23, 4294967168  ;;  %s131_s25 = scalar_lea.vmem [#allocation5], %s228_s22  ;;  %s231_s27 = sshll.u32 %s407_s10, 7  ;;  %v132_v0 = vld [vmem:[%s113_s24] sm:$0xff] }
  0x35   : > { %s152_s26 = sshll.u32 %s131_s25, 4  ;;  %vm133_vm0 = vcmp.ge.f32.partialorder %v132_v0, 1001.0  ;;  %vm134_vm1 = vcmp.le.f32.partialorder %v132_v0, 447113.0  ;;  %s150_s17 = scalar_lea.hbm %s534_s1, %s231_s27  ;;  %s493_s26 = int_to_ptr.vmem [resolvable:$true] %s152_s26 }
  0x36   : > { %vm135_vm2 = vmand %vm133_vm0, %vm134_vm1  ;;  %s139_s30 = scalar_lea.sflag [#allocation4], %s484_s21  ;;  %s308_s2 = scalar_lea.vmem %s493_s26, 128 }
  0x37   : > { %v136_v1 = vsel %vm135_vm2, %v132_v0, 0.0  ;;  %p309_p11 = scmp.ne.s32.totalorder %s493_s26, %s308_s2  ;;  %p545_p12 = scmp.ne.s32.totalorder %s539_s18, 0 }
  0x38   : > { %137 = vst [vmem:[%s131_s25] sm:$0xff] %v136_v1  ;;  %s375_s10 = smov [#allocation5]  }
  0x39   : > { %p310_p13 = pnand %p309_p11, %p545_p12  ;;  %s312_s3 = sshll.u32 %s375_s10, 4  ;;  %s313_s3 = int_to_ptr.vmem [resolvable:$false] %s312_s3 }
  0x3a   : > { %s314_s4 = scalar_lea.vmem %s313_s3, 256  ;;  %p315_p3 = scmp.lt.s32.totalorder %s493_s26, %s313_s3 }
  0x3b   : > { %p311_p1 = pneg %p310_p13  ;;  %p316_p5 = scmp.lt.s32.totalorder %s314_s4, %s308_s2 }
  0x3d   : > { %p317_p8 = por %p316_p5, %p315_p3 }
  0x3f   : > { %p318_p10 = pnand %p317_p8, %p311_p1 }
  0x41   : > { %321 = shalt.err (!%p318_p10)
}
  0x42   : > { %s322_s5 = scalar_lea.hbm %s150_s17, 128  ;;  %s326_s14 = scalar_lea.hbm %s534_s1, 256 }
  0x43   : > { %p323_p2 = scmp.ne.s32.totalorder %s150_s17, %s322_s5  ;;  %p327_p7 = scmp.lt.s32.totalorder %s150_s17, %s534_s1 }
  0x44   : > { %p328_p0 = scmp.lt.s32.totalorder %s326_s14, %s322_s5 }
  0x45   : > { %p324_p4 = pnand %p323_p2, %p545_p12 }
  0x46   : > { %p329_p6 = por %p328_p0, %p327_p7 }
  0x47   : > { %p325_p9 = pneg %p324_p4 }
  0x49   : > { %p330_p11 = pnand %p329_p6, %p325_p9 }
  0x4b   : > { %333 = shalt.err (!%p330_p11)
}
  0x4c   : > { %236 = dma.vmem_to_hbm [thread:$0]  (%p545_p12), %s493_s26, 128, %s150_s17, %s139_s30  }
  0x4d PF: > { %s164_s21 = sand.u32 1, %s360_s6   ;;  %p546_p13 = scmp.ne.s32.totalorder %s540_s19, 0 }
  0x4e   : > { %p547_p1 = scmp.ge.s32.totalorder %s372_s9, 2  ;;  %s165_s22 = scalar_lea.sflag [#allocation4], %s164_s21 }
  0x50   : > { %p243_p3 = pnand %p547_p1, %p546_p13 }
  0x52   : > { %p244_p5 = pneg %p243_p3 }
  0x54   : > { %355 = dma.done.wait (%p244_p5), %s165_s22, 128  }
  0x55   : > { %357 = vsyncadd (%p244_p5), %s165_s22, 4294967168  ;;  %p14_p8 = scmp.ge.s32.totalorder %s411_s12, 4   ;;  %s548_s6 = smov %s364_s7 }
  0x56   : > { %s549_s7 = smov %s368_s8  ;;  %s550_s8 = smov %s423_s15 }
  0x57   : > { %s551_s9 = smov %s411_s12  ;;  %16 = sbr.rel (!%p14_p8) target bundleno = 5 (0x5), region = 69 }
  0x5c   :  { %170 = vsyncpa [#allocation3], 1 }
  0x5d   :  { %172 = vsyncpa [#allocation3 + $0x1], 1 }
  0x5e   :  { %173 = vsyncpa [#allocation4], 1 }
  0x5f   :  { %175 = vsyncpa [#allocation4 + $0x1], 1 }

</bundles_post_ra>
